<compile_context>
chip_gen: v7x
topology: tpu7x:2x2x1
jax: 0.10.0
libtpu: 0.0.40
codegen_flags: <defaults>
</compile_context>

<pallas_src>
import functools

import jax
import jax.numpy as jnp
from jax.experimental import pallas as pl
from jax.experimental.pallas import tpu as pltpu


def _poly1_ce_kernel(logits_ref, labels_ref, *rest, epsilon, has_weight):
    """poly1 = CE + eps*(1 - pt) for a tile of rows; lane-dense (1,1,TM) store."""
    if has_weight:
        wlab_ref, out_ref = rest
    else:
        (out_ref,) = rest

    x = logits_ref[...].astype(jnp.float32)          # (TM, C) upcast in-kernel
    labels = labels_ref[...]                         # (TM, 1) int32

    tm, c = x.shape
    class_ids = jax.lax.broadcasted_iota(jnp.int32, (tm, c), 1)
    onehot = class_ids == labels                     # (TM, C) bool

    # numerically stable log-softmax pieces
    m = jnp.max(x, axis=-1, keepdims=True)                       # (TM, 1)
    shifted = x - m
    sumexp = jnp.sum(jnp.exp(shifted), axis=-1, keepdims=True)   # (TM, 1)
    lse = m + jnp.log(sumexp)                                    # logsumexp

    label_logit = jnp.sum(jnp.where(onehot, x, 0.0),
                          axis=-1, keepdims=True)                # x[label]

    ce = lse - label_logit                                       # NLL
    if has_weight:
        ce = wlab_ref[...].astype(jnp.float32) * ce              # weight[label]*CE
    pt = jnp.exp(label_logit - lse)                              # softmax[label]
    poly1 = ce + epsilon * (1.0 - pt)                            # (TM, 1)

    # Lane-dense store: (TM, 1) -> (1, TM) -> (1, 1, TM). One cheap XLU
    # relayout per tile instead of masked last-dim-1 stores.
    out_ref[...] = jnp.transpose(poly1).reshape(1, 1, tm).astype(out_ref.dtype)


def _choose_block_rows(n, c, itemsize):
    """Largest row tile that keeps one double-buffered logits tile modest.

    Budget ~8 MiB per logits pipeline buffer (16 MiB double-buffered) so it
    fits comfortably on v5e/v6e/v7x with the 32 MiB scoped limit we request.
    """
    per_buf_budget = 8 * 1024 * 1024
    rows = per_buf_budget // max(1, c * itemsize)
    rows = min(rows, 2048)                      # diminishing returns past this
    n_pad = -(-n // 8) * 8
    rows = min(rows, n_pad)
    if rows >= 128:
        rows = (rows // 128) * 128              # lane-dense, unmasked stores
    else:
        rows = max(8, (rows // 8) * 8)          # f32 sublane multiple
    return rows


def poly1_cross_entropy_loss(logits, labels, *, num_classes, epsilon=1.0,
                             reduction="none", weight=None, block_rows=None):
    """JAX/Pallas equivalent of Poly1CrossEntropyLoss.forward."""
    n, c = logits.shape
    assert c == num_classes, "logits last dim must equal num_classes"

    itemsize = jnp.dtype(logits.dtype).itemsize
    if block_rows is None:
        block_rows = _choose_block_rows(n, c, itemsize)
    num_tiles = pl.cdiv(n, block_rows)

    labels_i32 = labels.astype(jnp.int32)
    labels2d = labels_i32.reshape(n, 1)

    has_weight = weight is not None
    kernel = functools.partial(_poly1_ce_kernel, epsilon=float(epsilon),
                               has_weight=has_weight)

    in_specs = [
        pl.BlockSpec((block_rows, c), lambda i: (i, 0)),    # logits tile (native dtype)
        pl.BlockSpec((block_rows, 1), lambda i: (i, 0)),    # labels column
    ]
    args = [logits, labels2d]
    if has_weight:
        # Host-side gather of the per-sample class weight (tiny XLA op); the
        # kernel then avoids a full (TM, C) multiply + cross-lane reduce.
        w_label = jnp.take(weight, labels_i32, axis=0).reshape(n, 1)
        in_specs.append(pl.BlockSpec((block_rows, 1), lambda i: (i, 0)))
        args.append(w_label)

    out = pl.pallas_call(
        kernel,
        out_shape=jax.ShapeDtypeStruct((num_tiles, 1, block_rows), jnp.float32),
        grid=(num_tiles,),
        in_specs=in_specs,
        out_specs=pl.BlockSpec((1, 1, block_rows), lambda i: (i, 0, 0)),
        compiler_params=pltpu.CompilerParams(
            dimension_semantics=("parallel",),          # lets v7x use both TCs
            vmem_limit_bytes=32 * 1024 * 1024,          # safe on v5e/v6e/v7x
        ),
    )(*args)

    # Drop padded rows of the (possibly partial) last tile; stay in f32 for
    # any reduction, cast to the input dtype only at the very end.
    poly1 = out.reshape(-1)[:n]

    # Reduction glue (matches the module: plain mean/sum, not the
    # weight-normalized mean of F.cross_entropy(reduction='mean', weight=...)).
    if reduction == "mean":
        return poly1.mean().astype(logits.dtype)
    if reduction == "sum":
        return poly1.sum().astype(logits.dtype)
    return poly1.astype(logits.dtype)


def _reference(logits, labels, num_classes, epsilon, weight=None):
    """Pure-JAX reference (f32) for a sanity check."""
    x = logits.astype(jnp.float32)
    onehot = jax.nn.one_hot(labels, num_classes, dtype=jnp.float32)
    logp = jax.nn.log_softmax(x, axis=-1)
    ce = -jnp.sum(onehot * logp, axis=-1)
    if weight is not None:
        ce = weight.astype(jnp.float32)[labels] * ce
    pt = jnp.sum(onehot * jax.nn.softmax(x, axis=-1), axis=-1)
    return ce + epsilon * (1.0 - pt)


if __name__ == "__main__":
    N, NUM_CLASSES = 8, 16
    EPSILON = 1.0

    key = jax.random.PRNGKey(0)
    k_logits, k_labels, k_w = jax.random.split(key, 3)
    logits = jax.random.normal(k_logits, (N, NUM_CLASSES), dtype=jnp.float32)
    labels = jax.random.randint(k_labels, (N,), 0, NUM_CLASSES, dtype=jnp.int32)
    weight = jax.random.uniform(k_w, (NUM_CLASSES,), dtype=jnp.float32,
                                minval=0.5, maxval=1.5)

    # reduction='none', no class weight
    loss = poly1_cross_entropy_loss(
        logits, labels, num_classes=NUM_CLASSES, epsilon=EPSILON, reduction="none"
    )
    jax.block_until_ready(loss)
    ref = _reference(logits, labels, NUM_CLASSES, EPSILON, None)
    assert loss.shape == (N,)
    assert jnp.allclose(loss, ref, atol=1e-5, rtol=1e-5)

    # reduction='mean', with a per-class weight
    loss_m = poly1_cross_entropy_loss(
        logits, labels, num_classes=NUM_CLASSES, epsilon=EPSILON,
        reduction="mean", weight=weight,
    )
    jax.block_until_ready(loss_m)
    ref_m = _reference(logits, labels, NUM_CLASSES, EPSILON, weight).mean()
    assert jnp.allclose(loss_m, ref_m, atol=1e-5, rtol=1e-5)

    print("KERNEL_OK")
</pallas_src>

<mosaic_0001>
module attributes {stable_mosaic.version = 11 : i64} {
  func.func @_poly1_ce_kernel(%arg0: i32, %arg1: memref<8x16xf32, #tpu.memory_space<vmem>>, %arg2: memref<8x1xi32, #tpu.memory_space<vmem>>, %arg3: memref<1x1x8xf32, #tpu.memory_space<vmem>>) attributes {dimension_semantics = [#tpu.dimension_semantics<parallel>], iteration_bounds = array<i64: 1>, scalar_prefetch = 0 : i64, scratch_operands = 0 : i64, tpu.core_type = #tpu.core_type<tc>, window_params = [{transform_indices = @transform_0, window_bounds = array<i64: 8, 16>}, {transform_indices = @transform_1, window_bounds = array<i64: 8, 1>}, {transform_indices = @transform_2, window_bounds = array<i64: 1, 1, 8>}]} {
    %c0 = arith.constant 0 : index
    %c0_0 = arith.constant 0 : index
    %0 = vector.load %arg1[%c0, %c0_0] : memref<8x16xf32, #tpu.memory_space<vmem>>, vector<8x16xf32>
    %c0_1 = arith.constant 0 : index
    %c0_2 = arith.constant 0 : index
    %1 = vector.load %arg2[%c0_1, %c0_2] : memref<8x1xi32, #tpu.memory_space<vmem>>, vector<8x1xi32>
    %2 = tpu.iota {dimensions = array<i32: 1>} : vector<8x16xi32>
    %3 = vector.broadcast %1 : vector<8x1xi32> to vector<8x16xi32>
    %4 = arith.cmpi eq, %2, %3 : vector<8x16xi32>
    %cst = arith.constant dense<0xFF800000> : vector<8xf32>
    %5 = vector.multi_reduction <maximumf>, %0, %cst [1] : vector<8x16xf32> to vector<8xf32>
    %6 = vector.shape_cast %5 : vector<8xf32> to vector<8x1xf32>
    %7 = vector.broadcast %6 : vector<8x1xf32> to vector<8x16xf32>
    %8 = arith.subf %0, %7 : vector<8x16xf32>
    %9 = math.exp %8 : vector<8x16xf32>
    %cst_3 = arith.constant dense<0.000000e+00> : vector<8xf32>
    %10 = vector.multi_reduction <add>, %9, %cst_3 [1] : vector<8x16xf32> to vector<8xf32>
    %11 = vector.shape_cast %10 : vector<8xf32> to vector<8x1xf32>
    %12 = math.log %11 : vector<8x1xf32>
    %13 = arith.addf %6, %12 : vector<8x1xf32>
    %cst_4 = arith.constant 0.000000e+00 : f32
    %14 = vector.broadcast %cst_4 : f32 to vector<8x16xf32>
    %15 = arith.select %4, %0, %14 : vector<8x16xi1>, vector<8x16xf32>
    %cst_5 = arith.constant dense<0.000000e+00> : vector<8xf32>
    %16 = vector.multi_reduction <add>, %15, %cst_5 [1] : vector<8x16xf32> to vector<8xf32>
    %17 = vector.shape_cast %16 : vector<8xf32> to vector<8x1xf32>
    %18 = arith.subf %13, %17 : vector<8x1xf32>
    %19 = arith.subf %17, %13 : vector<8x1xf32>
    %20 = math.exp %19 : vector<8x1xf32>
    %cst_6 = arith.constant 1.000000e+00 : f32
    %21 = vector.broadcast %cst_6 : f32 to vector<8x1xf32>
    %22 = arith.subf %21, %20 : vector<8x1xf32>
    %cst_7 = arith.constant 1.000000e+00 : f32
    %23 = vector.broadcast %cst_7 : f32 to vector<8x1xf32>
    %24 = arith.mulf %23, %22 : vector<8x1xf32>
    %25 = arith.addf %18, %24 : vector<8x1xf32>
    %26 = tpu.transpose %25, [1, 0] : vector<8x1xf32> -> vector<1x8xf32>
    %27 = vector.shape_cast %26 : vector<1x8xf32> to vector<1x1x8xf32>
    %c0_8 = arith.constant 0 : index
    %c0_9 = arith.constant 0 : index
    %c0_10 = arith.constant 0 : index
    %28 = vector.load %arg3[%c0_8, %c0_9, %c0_10] : memref<1x1x8xf32, #tpu.memory_space<vmem>>, vector<1x1x8xf32>
    tpu.vector_store %arg3[%c0_8, %c0_9, %c0_10], %27 {strides = array<i32>} : memref<1x1x8xf32, #tpu.memory_space<vmem>>, vector<1x1x8xf32>,
    return
  }
  func.func @transform_0(%arg0: i32) -> (i32, i32) {
    %c0_i32 = arith.constant 0 : i32
    %c0_i32_0 = arith.constant 0 : i32
    return %arg0, %c0_i32 : i32, i32
  }
  func.func @transform_1(%arg0: i32) -> (i32, i32) {
    %c0_i32 = arith.constant 0 : i32
    %c0_i32_0 = arith.constant 0 : i32
    return %arg0, %c0_i32 : i32, i32
  }
  func.func @transform_2(%arg0: i32) -> (i32, i32, i32) {
    %c0_i32 = arith.constant 0 : i32
    %c0_i32_0 = arith.constant 0 : i32
    %c0_i32_1 = arith.constant 0 : i32
    return %arg0, %c0_i32, %c0_i32_0 : i32, i32, i32
  }
}

</mosaic_0001>

<bundles_post_ra>
// kernel: tpu_custom_call.1
= control target key start
LH: loop header
LB: loop body
LE: loop exit
PB: predicated region body
PF: predicated region fallthrough
CT: control target
= control target key end

     0   :  { %vm20_vm0 = vcmask 130048   ;;  %s163_s0 = inlined_call_operand.vmem [shape: f32[8,16], index: 0, kind: input, shape index: {}]   ;;  %s164_s1 = inlined_call_operand.vmem [shape: s32[8,1], index: 1, kind: input, shape index: {}]   ;;  %s165_s2 = inlined_call_operand.hbm [shape: f32[1,1,8], index: 2, kind: output, shape index: {}]  }
   0x1   :  { %v12_v0 = vld [vmem:[%s163_s0] sm:$0xff] }
   0x2   :  { %7 = vsyncpa [#allocation3], 0  ;;  %v21_v1 = vsel %vm20_vm0, %v12_v0, -inf  ;;  %v125_v2 = vmov 0   ;;  %v13_v3 = vld [vmem:[%s164_s1] sm:$0xff]  ;;  %v14_v7 = vlaneseq  ;;  %s126_s0 = smov [#allocation2]  }
   0x3   :  { %94 = vset.pattern.permute.xlu0 %v125_v2  ;;  %s83_s1 = sshll.u32 %s126_s0, 4  ;;  %vm75_vm2 = vcmask 57344   ;;  %s84_s1 = int_to_ptr.vmem [resolvable:$true] %s83_s1 }
   0x4   :  { %22 = vmax.xlane.f32.xlu0 %v21_v1  ;;  %v15_v8 = vand.u32 127, %v14_v7  ;;  %s101_s13 = scalar_lea.vmem %s84_s1, 16  ;;  %s105_s14 = scalar_lea.vmem %s84_s1, 32 }
   0x5   :  { %p102_p0 = scmp.ne.s32.totalorder %s84_s1, %s101_s13  ;;  %p106_p1 = scmp.lt.s32.totalorder %s84_s1, %s84_s1 }
   0x6   :  { %p107_p2 = scmp.lt.s32.totalorder %s105_s14, %s101_s13 }
   0x8   :  { %p108_p3 = por %p107_p2, %p106_p1 }
   0xa   :  { %p109_p4 = pnand %p108_p3, %p102_p0 }
  0x1a   :  { %17 = vperm.xlu0 %94, %v13_v3  }
  0x91   :  { %v23_v4 = vpop.xlane.xlu0 %22 }
  0x92   :  { %v24_v5 = vsub.f32 %v12_v0, %v23_v4 }
  0x94   :  { %v25_v6 = vmul.f32 1.442695, %v24_v5 }
  0x96   :  { %95 = vpow2.f32 %v25_v6 }
  0x99   :  { %v18_v9 = vpop.permute.xlu0 %17 }
  0x9a   :  { %vm19_vm1 = vcmp.eq.s32.totalorder %v15_v8, %v18_v9 }
  0x9b   :  { %v33_v11 = vsel %vm19_vm1, %v12_v0, 0.0 }
  0x9c   :  { %v34_v13 = vsel %vm20_vm0, %v33_v11, 0.0 }
  0xa0   :  { %v96_v10 = vpop.eup %95 }
  0xa1   :  { %v27_v12 = vsel %vm20_vm0, %v96_v10, 0.0 }
  0xa2   :  { %28 = vadd.xlane.f32.xlu1 %v27_v12 }
  0xa6   :  { %35 = vadd.xlane.f32.xlu1 %v34_v13 }
 0x12f   :  { %v29_v14 = vpop.xlane.xlu1 %28 }
 0x130   :  { %97 = vlog2.f32 %v29_v14 }
 0x133   :  { %v36_v17 = vpop.xlane.xlu1 %35 }
 0x13a   :  { %v98_v15 = vpop.eup %97 }
 0x13b   :  { %v31_v16 = vmul.f32 0.6931472, %v98_v15 }
 0x13d   :  { %v32_v18 = vadd.f32 %v31_v16, %v23_v4 }
 0x13f   :  { %v38_v19 = vsub.f32 %v36_v17, %v32_v18  ;;  %v37_v22 = vsub.f32 %v32_v18, %v36_v17 }
 0x141   :  { %v39_v20 = vmul.f32 1.442695, %v38_v19 }
 0x143   :  { %99 = vpow2.f32 %v39_v20 }
 0x14d   :  { %v100_v21 = vpop.eup %99 }
 0x14e   :  { %v41_v23 = vsub.f32 1.0, %v100_v21 }
 0x150   :  { %v42_v24 = vadd.f32 %v41_v23, %v37_v22 }
 0x152   :  { %43 = vxpose.xlu1.b32.start.end [1/1] (short) (narrow) %v42_v24, 8 }
 0x1d2   :  { %v59_v25 = vpop.trf.xlu1 }
 0x1d3   :  { %76 = vst.msk [vmem:[#allocation2] sm:$0x1] %vm75_vm2, %v59_v25 }
 0x1d4   :  { %112 = shalt.err (!%p109_p4)
}
 0x1d5   :  { %s113_s17 = scalar_lea.hbm %s165_s2, 16 }
 0x1d6   :  { %p114_p5 = scmp.ne.s32.totalorder %s165_s2, %s113_s17  ;;  %p117_p6 = scmp.lt.u32.totalorder %s113_s17, %s165_s2 }
 0x1d8   :  { %p119_p7 = pnand %p117_p6, %p114_p5 }
 0x1da   :  { %122 = shalt.err (!%p119_p7)
}
 0x1db   :  { %86 = dma.vmem_to_hbm [thread:$0]  %s84_s1, 16, %s165_s2, [#allocation3]  }
 0x1dc   :  { %123 = dma.done.wait [#allocation3], 16  }
 0x1dd   :  { %124 = vsyncadd [#allocation3], 4294967280 }
 0x1de   :  { %90 = vsyncpa [#allocation3], 1 }

</bundles_post_ra>
